<compile_context>
chip_gen: v5e
topology: v5e:2x2
jax: 0.10.0
libtpu: 0.0.40
codegen_flags: <defaults>
</compile_context>

<pallas_src>
import math
import jax
import jax.numpy as jnp
from jax.experimental import pallas as pl
from jax.experimental.pallas import tpu as pltpu

HIDDEN = 256
SUBLANE = 8


def _round_up(x, m):
    return (x + m - 1) // m * m


def _choose_batch_tile(B, batch_tile, min_grid_steps=2):
    """Batch tile that (a) satisfies the sublane rule (multiple of 8, or the
    full batch), (b) balances grid steps so the last tile isn't nearly empty,
    and (c) keeps >= min_grid_steps steps when the batch allows it (v7x
    megacore sharding of the 'parallel' axis)."""
    if B <= SUBLANE:
        return B                                   # full-dim block, 1 step
    max_tile = _round_up(B, SUBLANE)
    steps = pl.cdiv(B, batch_tile)
    if B >= min_grid_steps * SUBLANE:
        steps = max(steps, min_grid_steps)
    tb = _round_up(pl.cdiv(B, steps), SUBLANE)
    return min(tb, max_tile)


def _actor_kernel(ma_ref, x_ref, w1_ref, b1_ref, w2_ref, b2_ref,
                  w3_ref, b3_ref, o_ref):
    """One batch tile: x (tb, state_dim) -> out (tb, action_dim).
    Weights/biases stay VMEM-resident across grid steps."""
    ma = ma_ref[0, 0]            # SMEM scalar: runtime value, no recompile cliff
    mm_dt = w2_ref.dtype         # f32, or bf16 for 2x MXU throughput (layers 2/3)

    x = x_ref[...]
    # Layer 1 stays in the weights' (f32) dtype: tiny FLOP fraction, keeps
    # input precision.
    h1 = jnp.dot(x.astype(w1_ref.dtype), w1_ref[...],
                 preferred_element_type=jnp.float32) + b1_ref[...]
    h1 = jnp.maximum(h1, 0.0)                                  # ReLU (f32, VPU)

    h2 = jnp.dot(h1.astype(mm_dt), w2_ref[...],
                 preferred_element_type=jnp.float32) + b2_ref[...]
    h2 = jnp.maximum(h2, 0.0)                                  # ReLU (f32, VPU)

    h3 = jnp.dot(h2.astype(mm_dt), w3_ref[...],
                 preferred_element_type=jnp.float32) + b3_ref[...]
    o_ref[...] = (ma * jnp.tanh(h3)).astype(o_ref.dtype)       # Tanh (f32, EUP)


def prepare_actor_params(params, matmul_dtype=jnp.float32):
    """One-time param prep (hoisted out of the per-forward path): cast the
    layer-2/3 weights to the MXU operand dtype.  Layer-1 weights and all
    biases stay f32.  bf16 is profitable on v5e, v6e and v7x."""
    w1, b1, w2, b2, w3, b3 = params
    return (w1.astype(jnp.float32), b1.astype(jnp.float32),
            w2.astype(matmul_dtype), b2.astype(jnp.float32),
            w3.astype(matmul_dtype), b3.astype(jnp.float32))


def actor_forward(state, params, max_action, *, batch_tile=1024):
    """state: (B, state_dim) f32. params: output of init_actor_params (or
    prepare_actor_params for the bf16 fast path). Returns (B, action_dim) f32.

    batch_tile: rows per grid step.  1024 amortizes the per-grid-step overhead
    on v6e/v7x while staying a tiny fraction of VMEM; the helper keeps >=2 grid
    steps when possible so v7x uses both TensorCores.
    """
    w1, b1, w2, b2, w3, b3 = params
    B, state_dim = state.shape
    action_dim = w3.shape[1]

    tb = _choose_batch_tile(B, batch_tile)
    grid = (pl.cdiv(B, tb),)
    rows = grid[0] * tb

    ma = jnp.full((1, 1), max_action, jnp.float32)

    # Weights use constant index maps -> VMEM resident across all grid steps.
    const = lambda r, c: pl.BlockSpec((r, c), lambda i: (0, 0))
    cost = pl.CostEstimate(
        flops=2 * rows * (state_dim * HIDDEN + HIDDEN * HIDDEN
                          + HIDDEN * action_dim),
        transcendentals=rows * action_dim,
        bytes_accessed=4 * (B * state_dim + B * action_dim
                            + 3 * HIDDEN + action_dim)
        + w1.dtype.itemsize * state_dim * HIDDEN
        + w2.dtype.itemsize * HIDDEN * HIDDEN
        + w3.dtype.itemsize * HIDDEN * action_dim,
    )

    out = pl.pallas_call(
        _actor_kernel,
        out_shape=jax.ShapeDtypeStruct((B, action_dim), jnp.float32),
        grid=grid,
        in_specs=[
            pl.BlockSpec(memory_space=pltpu.MemorySpace.SMEM),     # max_action
            pl.BlockSpec((tb, state_dim), lambda i: (i, 0)),       # x tile
            const(state_dim, HIDDEN),                              # w1 (resident)
            const(1, HIDDEN),                                      # b1
            const(HIDDEN, HIDDEN),                                 # w2 (resident)
            const(1, HIDDEN),                                      # b2
            const(HIDDEN, action_dim),                             # w3 (resident)
            const(1, action_dim),                                  # b3
        ],
        out_specs=pl.BlockSpec((tb, action_dim), lambda i: (i, 0)),
        compiler_params=pltpu.CompilerParams(
            dimension_semantics=("parallel",)),
        cost_estimate=cost,
    )(ma, state, w1, b1, w2, b2, w3, b3)

    return out


def init_actor_params(key, state_dim, action_dim):
    """Matches PyTorch nn.Linear default init: U(-1/sqrt(fan_in), 1/sqrt(fan_in)).
    Weights stored transposed vs. PyTorch: (in_features, out_features)."""
    def linear(key, fan_in, fan_out):
        kw, kb = jax.random.split(key)
        bound = 1.0 / math.sqrt(fan_in)
        w = jax.random.uniform(kw, (fan_in, fan_out), jnp.float32, -bound, bound)
        b = jax.random.uniform(kb, (1, fan_out), jnp.float32, -bound, bound)
        return w, b

    k1, k2, k3 = jax.random.split(key, 3)
    w1, b1 = linear(k1, state_dim, HIDDEN)
    w2, b2 = linear(k2, HIDDEN, HIDDEN)
    w3, b3 = linear(k3, HIDDEN, action_dim)
    return (w1, b1, w2, b2, w3, b3)


def actor_reference(state, params, max_action):
    w1, b1, w2, b2, w3, b3 = params
    h1 = jnp.maximum(state @ w1 + b1, 0.0)
    h2 = jnp.maximum(h1 @ w2 + b2, 0.0)
    return max_action * jnp.tanh(h2 @ w3 + b3)


if __name__ == "__main__":
    key = jax.random.PRNGKey(0)
    k_params, k_state = jax.random.split(key)

    batch = 2
    state_dim = 8
    action_dim = 4
    max_action = 2.0

    params = init_actor_params(k_params, state_dim, action_dim)
    state = jax.random.normal(k_state, (batch, state_dim), jnp.float32)
    ref = actor_reference(state, params, max_action)

    # f32 matmuls, tiny batch (single full-dim tile): exact parity.
    out = jax.block_until_ready(actor_forward(state, params, max_action))
    assert out.shape == (batch, action_dim), out.shape
    assert jnp.allclose(out, ref, atol=1e-5, rtol=1e-5), (
        f"f32 mismatch: max abs err {jnp.max(jnp.abs(out - ref))}")

    # Multi-step grid with an uneven final tile (exercises OOB masking and the
    # balanced-tile / >=2-step logic).
    state2 = jax.random.normal(jax.random.PRNGKey(1), (20, state_dim), jnp.float32)
    ref2 = actor_reference(state2, params, max_action)
    out2 = jax.block_until_ready(
        actor_forward(state2, params, max_action, batch_tile=8))
    assert out2.shape == (20, action_dim), out2.shape
    assert jnp.allclose(out2, ref2, atol=1e-5, rtol=1e-5), (
        f"tiled mismatch: max abs err {jnp.max(jnp.abs(out2 - ref2))}")

    # Larger non-multiple batch with default tile (2 balanced grid steps).
    state3 = jax.random.normal(jax.random.PRNGKey(2), (300, state_dim), jnp.float32)
    ref3 = actor_reference(state3, params, max_action)
    out3 = jax.block_until_ready(actor_forward(state3, params, max_action))
    assert out3.shape == (300, action_dim), out3.shape
    assert jnp.allclose(out3, ref3, atol=1e-5, rtol=1e-5), (
        f"large-batch mismatch: max abs err {jnp.max(jnp.abs(out3 - ref3))}")

    # bf16 operands for layers 2/3 (prep hoisted out of the forward path);
    # layer 1 and all accumulation stay f32 -> modest tolerance.
    params_bf16 = jax.tree.map(jax.block_until_ready,
                               prepare_actor_params(params, jnp.bfloat16))
    out_bf16 = jax.block_until_ready(
        actor_forward(state, params_bf16, max_action))
    assert jnp.allclose(out_bf16, ref, atol=0.1, rtol=0.05), (
        f"bf16 mismatch: max abs err {jnp.max(jnp.abs(out_bf16 - ref))}")

    print("KERNEL_OK")
</pallas_src>

<mosaic_0001>
module attributes {stable_mosaic.version = 11 : i64} {
  func.func @_actor_kernel(%arg0: i32, %arg1: memref<1x1xf32, #tpu.memory_space<smem>>, %arg2: memref<2x8xf32, #tpu.memory_space<vmem>>, %arg3: memref<8x256xf32, #tpu.memory_space<vmem>>, %arg4: memref<1x256xf32, #tpu.memory_space<vmem>>, %arg5: memref<256x256xf32, #tpu.memory_space<vmem>>, %arg6: memref<1x256xf32, #tpu.memory_space<vmem>>, %arg7: memref<256x4xf32, #tpu.memory_space<vmem>>, %arg8: memref<1x4xf32, #tpu.memory_space<vmem>>, %arg9: memref<2x4xf32, #tpu.memory_space<vmem>>) attributes {dimension_semantics = [#tpu.dimension_semantics<parallel>], iteration_bounds = array<i64: 1>, scalar_prefetch = 0 : i64, scratch_operands = 0 : i64, tpu.core_type = #tpu.core_type<tc>, window_params = [{transform_indices = @transform_0, window_bounds = array<i64: 1, 1>}, {transform_indices = @transform_1, window_bounds = array<i64: 2, 8>}, {pipeline_mode = #tpu.pipeline_mode<synchronous>, transform_indices = @transform_2, window_bounds = array<i64: 8, 256>}, {pipeline_mode = #tpu.pipeline_mode<synchronous>, transform_indices = @transform_3, window_bounds = array<i64: 1, 256>}, {pipeline_mode = #tpu.pipeline_mode<synchronous>, transform_indices = @transform_4, window_bounds = array<i64: 256, 256>}, {pipeline_mode = #tpu.pipeline_mode<synchronous>, transform_indices = @transform_5, window_bounds = array<i64: 1, 256>}, {pipeline_mode = #tpu.pipeline_mode<synchronous>, transform_indices = @transform_6, window_bounds = array<i64: 256, 4>}, {pipeline_mode = #tpu.pipeline_mode<synchronous>, transform_indices = @transform_7, window_bounds = array<i64: 1, 4>}, {transform_indices = @transform_8, window_bounds = array<i64: 2, 4>}]} {
    %c0 = arith.constant 0 : index
    %c0_0 = arith.constant 0 : index
    %0 = memref.load %arg1[%c0, %c0_0] : memref<1x1xf32, #tpu.memory_space<smem>>
    %c0_1 = arith.constant 0 : index
    %c0_2 = arith.constant 0 : index
    %1 = vector.load %arg2[%c0_1, %c0_2] : memref<2x8xf32, #tpu.memory_space<vmem>>, vector<2x8xf32>
    %c0_3 = arith.constant 0 : index
    %c0_4 = arith.constant 0 : index
    %2 = vector.load %arg3[%c0_3, %c0_4] : memref<8x256xf32, #tpu.memory_space<vmem>>, vector<8x256xf32>
    %cst = arith.constant dense<0.000000e+00> : vector<2x256xf32>
    %3 = tpu.matmul %1, %2, %cst {dimension_numbers = #tpu.dot_dimension_numbers<[1], [0], [0], [1], [0, 0, 1, 1], [], []>} : vector<2x8xf32>, vector<8x256xf32>, vector<2x256xf32> -> vector<2x256xf32>
    %c0_5 = arith.constant 0 : index
    %c0_6 = arith.constant 0 : index
    %4 = vector.load %arg4[%c0_5, %c0_6] : memref<1x256xf32, #tpu.memory_space<vmem>>, vector<1x256xf32>
    %5 = vector.broadcast %4 : vector<1x256xf32> to vector<2x256xf32>
    %6 = arith.addf %3, %5 : vector<2x256xf32>
    %cst_7 = arith.constant 0.000000e+00 : f32
    %7 = vector.broadcast %cst_7 : f32 to vector<2x256xf32>
    %8 = arith.maximumf %6, %7 : vector<2x256xf32>
    %c0_8 = arith.constant 0 : index
    %c0_9 = arith.constant 0 : index
    %9 = vector.load %arg5[%c0_8, %c0_9] : memref<256x256xf32, #tpu.memory_space<vmem>>, vector<256x256xf32>
    %cst_10 = arith.constant dense<0.000000e+00> : vector<2x256xf32>
    %10 = tpu.matmul %8, %9, %cst_10 {dimension_numbers = #tpu.dot_dimension_numbers<[1], [0], [0], [1], [0, 0, 1, 1], [], []>} : vector<2x256xf32>, vector<256x256xf32>, vector<2x256xf32> -> vector<2x256xf32>
    %c0_11 = arith.constant 0 : index
    %c0_12 = arith.constant 0 : index
    %11 = vector.load %arg6[%c0_11, %c0_12] : memref<1x256xf32, #tpu.memory_space<vmem>>, vector<1x256xf32>
    %12 = vector.broadcast %11 : vector<1x256xf32> to vector<2x256xf32>
    %13 = arith.addf %10, %12 : vector<2x256xf32>
    %cst_13 = arith.constant 0.000000e+00 : f32
    %14 = vector.broadcast %cst_13 : f32 to vector<2x256xf32>
    %15 = arith.maximumf %13, %14 : vector<2x256xf32>
    %c0_14 = arith.constant 0 : index
    %c0_15 = arith.constant 0 : index
    %16 = vector.load %arg7[%c0_14, %c0_15] : memref<256x4xf32, #tpu.memory_space<vmem>>, vector<256x4xf32>
    %cst_16 = arith.constant dense<0.000000e+00> : vector<2x4xf32>
    %17 = tpu.matmul %15, %16, %cst_16 {dimension_numbers = #tpu.dot_dimension_numbers<[1], [0], [0], [1], [0, 0, 1, 1], [], []>} : vector<2x256xf32>, vector<256x4xf32>, vector<2x4xf32> -> vector<2x4xf32>
    %c0_17 = arith.constant 0 : index
    %c0_18 = arith.constant 0 : index
    %18 = vector.load %arg8[%c0_17, %c0_18] : memref<1x4xf32, #tpu.memory_space<vmem>>, vector<1x4xf32>
    %19 = vector.broadcast %18 : vector<1x4xf32> to vector<2x4xf32>
    %20 = arith.addf %17, %19 : vector<2x4xf32>
    %21 = math.tanh %20 : vector<2x4xf32>
    %22 = vector.broadcast %0 : f32 to vector<2x4xf32>
    %23 = arith.mulf %22, %21 : vector<2x4xf32>
    %c0_19 = arith.constant 0 : index
    %c0_20 = arith.constant 0 : index
    %24 = vector.load %arg9[%c0_19, %c0_20] : memref<2x4xf32, #tpu.memory_space<vmem>>, vector<2x4xf32>
    tpu.vector_store %arg9[%c0_19, %c0_20], %23 {strides = array<i32>} : memref<2x4xf32, #tpu.memory_space<vmem>>, vector<2x4xf32>,
    return
  }
  func.func @transform_0(%arg0: i32) -> (i32, i32) {
    %c0_i32 = arith.constant 0 : i32
    %c0_i32_0 = arith.constant 0 : i32
    %c0_i32_1 = arith.constant 0 : i32
    return %c0_i32, %c0_i32_0 : i32, i32
  }
  func.func @transform_1(%arg0: i32) -> (i32, i32) {
    %c0_i32 = arith.constant 0 : i32
    %c0_i32_0 = arith.constant 0 : i32
    return %arg0, %c0_i32 : i32, i32
  }
  func.func @transform_2(%arg0: i32) -> (i32, i32) {
    %c0_i32 = arith.constant 0 : i32
    %c0_i32_0 = arith.constant 0 : i32
    %c0_i32_1 = arith.constant 0 : i32
    return %c0_i32, %c0_i32_0 : i32, i32
  }
  func.func @transform_3(%arg0: i32) -> (i32, i32) {
    %c0_i32 = arith.constant 0 : i32
    %c0_i32_0 = arith.constant 0 : i32
    %c0_i32_1 = arith.constant 0 : i32
    return %c0_i32, %c0_i32_0 : i32, i32
  }
  func.func @transform_4(%arg0: i32) -> (i32, i32) {
    %c0_i32 = arith.constant 0 : i32
    %c0_i32_0 = arith.constant 0 : i32
    %c0_i32_1 = arith.constant 0 : i32
    return %c0_i32, %c0_i32_0 : i32, i32
  }
  func.func @transform_5(%arg0: i32) -> (i32, i32) {
    %c0_i32 = arith.constant 0 : i32
    %c0_i32_0 = arith.constant 0 : i32
    %c0_i32_1 = arith.constant 0 : i32
    return %c0_i32, %c0_i32_0 : i32, i32
  }
  func.func @transform_6(%arg0: i32) -> (i32, i32) {
    %c0_i32 = arith.constant 0 : i32
    %c0_i32_0 = arith.constant 0 : i32
    %c0_i32_1 = arith.constant 0 : i32
    return %c0_i32, %c0_i32_0 : i32, i32
  }
  func.func @transform_7(%arg0: i32) -> (i32, i32) {
    %c0_i32 = arith.constant 0 : i32
    %c0_i32_0 = arith.constant 0 : i32
    %c0_i32_1 = arith.constant 0 : i32
    return %c0_i32, %c0_i32_0 : i32, i32
  }
  func.func @transform_8(%arg0: i32) -> (i32, i32) {
    %c0_i32 = arith.constant 0 : i32
    %c0_i32_0 = arith.constant 0 : i32
    return %arg0, %c0_i32 : i32, i32
  }
}

</mosaic_0001>

<bundles_post_ra>
// kernel: tpu_custom_call.1
= control target key start
LH: loop header
LB: loop body
LE: loop exit
PB: predicated region body
PF: predicated region fallthrough
CT: control target
= control target key end

     0   :  { %14 = vsyncpa [#allocation4], 0  ;;  %s586_s0 = inlined_call_operand.<no memory space> [shape: f32[1,1], index: 0, kind: input, shape index: {}]   ;;  %s587_s1 = inlined_call_operand.vmem [shape: f32[2,8], index: 1, kind: input, shape index: {}]   ;;  %s588_s2 = inlined_call_operand.vmem [shape: f32[8,256], index: 2, kind: input, shape index: {}]   ;;  %s589_s3 = inlined_call_operand.vmem [shape: f32[1,256], index: 3, kind: input, shape index: {}]   ;;  %s590_s4 = inlined_call_operand.hbm [shape: f32[256,256], index: 4, kind: input, shape index: {}]   ;;  %s591_s5 = inlined_call_operand.vmem [shape: f32[1,256], index: 5, kind: input, shape index: {}]   ;;  %s592_s6 = inlined_call_operand.vmem [shape: f32[256,4], index: 6, kind: input, shape index: {}]   ;;  %s593_s7 = inlined_call_operand.vmem [shape: f32[1,4], index: 7, kind: input, shape index: {}]   ;;  %s594_s8 = inlined_call_operand.hbm [shape: f32[2,4], index: 8, kind: output, shape index: {}]  }
   0x1   :  { %15 = vsyncpa [#allocation5], 0  ;;  %s28_s29 = sshll.u32 %s590_s4, 4  ;;  %s414_s30 = smov [#allocation3]   ;;  %s29_s29 = int_to_ptr.hbm [resolvable:$true] %s28_s29 }
   0x2   :  { %s30_s9 = sshll.u32 %s414_s30, 4  ;;  %s415_s10 = smov 256   ;;  %s31_s9 = int_to_ptr.vmem [resolvable:$true] %s30_s9 }
   0x3   :  { %s416_s11 = smov 16  }
   0x4   :  { %36 = dma.hbm_to_vmem [thread:$0]  %s29_s29, 8192, %s31_s9, [#allocation4], %s415_s10, %s415_s10, %s416_s11  }
   0x5   :  { %410 = dma.done.wait [#allocation4], 8192  }
   0x6   :  { %411 = vsyncadd [#allocation4], 4294959104  ;;  %vm57_vm0 = vcmask 64512   ;;  %v49_v0 = vld [vmem:[%s588_s2] sm:$0xff]  ;;  %v50_v2 = vld [vmem:[%s588_s2 + $0x8] sm:$0xff]  ;;  %s417_s12 = smov [#allocation6]  }
   0x7   :  { %v48_v1 = vld [vmem:[%s587_s1] sm:$0x3]  ;;  %76 = vmatpush.msra.mxu0 %v49_v0  ;;  %96 = vmatpush.msra.mxu1 %v50_v2  ;;  %v133_v3 = vld [vmem:[#allocation3 + $0xf0] sm:$0xff]  ;;  %v134_v4 = vld [vmem:[#allocation3 + $0xf8] sm:$0xff]  ;;  %s343_s15 = sshll.u32 %s594_s8, 4  ;;  %vm334_vm1 = vcmask 25600   ;;  %s344_s15 = int_to_ptr.hbm [resolvable:$true] %s343_s15 }
   0x8   :  { %v131_v5 = vld [vmem:[#allocation3 + $0xe0] sm:$0xff]  ;;  %353 = vmatmul.msk.f32.vlgmr.msra.gmra.mxu0 %vm57_vm0, %v48_v1  ;;  %354 = vmatmul.msk.f32.vlgmr.msra.gmra.mxu1 %vm57_vm0, %v48_v1  ;;  %v165_v6 = vld [vmem:[#allocation3 + $0x1f0] sm:$0xff]  ;;  %v132_v7 = vld [vmem:[#allocation3 + $0xe8] sm:$0xff] }
   0x9   :  { %v166_v8 = vld [vmem:[#allocation3 + $0x1f8] sm:$0xff]  ;;  %173 = vmatpush.msra.mxu2 %v133_v3  ;;  %213 = vmatpush.msrb.mxu0 %v134_v4  ;;  %v163_v9 = vld [vmem:[#allocation3 + $0x1e0] sm:$0xff]  ;;  %v129_v10 = vld [vmem:[#allocation3 + $0xd0] sm:$0xff] }
   0xa   :  { %193 = vmatpush.msra.mxu3 %v165_v6  ;;  %233 = vmatpush.msrb.mxu1 %v166_v8  ;;  %v130_v11 = vld [vmem:[#allocation3 + $0xd8] sm:$0xff]  ;;  %v164_v12 = vld [vmem:[#allocation3 + $0x1e8] sm:$0xff]  ;;  %v161_v13 = vld [vmem:[#allocation3 + $0x1d0] sm:$0xff] }
   0xb   :  { %174 = vmatpush.msra.mxu2 %v131_v5  ;;  %214 = vmatpush.msrb.mxu0 %v132_v7  ;;  %v162_v14 = vld [vmem:[#allocation3 + $0x1d8] sm:$0xff]  ;;  %v127_v15 = vld [vmem:[#allocation3 + $0xc0] sm:$0xff]  ;;  %v128_v16 = vld [vmem:[#allocation3 + $0xc8] sm:$0xff] }
   0xc   :  { %194 = vmatpush.msra.mxu3 %v163_v9  ;;  %234 = vmatpush.msrb.mxu1 %v164_v12  ;;  %v159_v17 = vld [vmem:[#allocation3 + $0x1c0] sm:$0xff]  ;;  %v160_v18 = vld [vmem:[#allocation3 + $0x1c8] sm:$0xff]  ;;  %v125_v19 = vld [vmem:[#allocation3 + $0xb0] sm:$0xff] }
   0xd   :  { %175 = vmatpush.msra.mxu2 %v129_v10  ;;  %215 = vmatpush.msrb.mxu0 %v130_v11  ;;  %v126_v20 = vld [vmem:[#allocation3 + $0xb8] sm:$0xff]  ;;  %v157_v21 = vld [vmem:[#allocation3 + $0x1b0] sm:$0xff]  ;;  %v123_v23 = vld [vmem:[#allocation3 + $0xa0] sm:$0xff] }
   0xe   :  { %195 = vmatpush.msra.mxu3 %v161_v13  ;;  %235 = vmatpush.msrb.mxu1 %v162_v14  ;;  %v158_v22 = vld [vmem:[#allocation3 + $0x1b8] sm:$0xff]  ;;  %v124_v24 = vld [vmem:[#allocation3 + $0xa8] sm:$0xff]  ;;  %v155_v25 = vld [vmem:[#allocation3 + $0x1a0] sm:$0xff] }
   0xf   :  { %176 = vmatpush.msra.mxu2 %v127_v15  ;;  %216 = vmatpush.msrb.mxu0 %v128_v16  ;;  %v156_v26 = vld [vmem:[#allocation3 + $0x1a8] sm:$0xff]  ;;  %v121_v27 = vld [vmem:[#allocation3 + $0x90] sm:$0xff]  ;;  %v122_v28 = vld [vmem:[#allocation3 + $0x98] sm:$0xff] }
  0x10   :  { %196 = vmatpush.msra.mxu3 %v159_v17  ;;  %236 = vmatpush.msrb.mxu1 %v160_v18  ;;  %v153_v29 = vld [vmem:[#allocation3 + $0x190] sm:$0xff]  ;;  %v154_v30 = vld [vmem:[#allocation3 + $0x198] sm:$0xff]  ;;  %v119_v31 = vld [vmem:[#allocation3 + $0x80] sm:$0xff] }
  0x11   :  { %177 = vmatpush.msra.mxu2 %v125_v19  ;;  %217 = vmatpush.msrb.mxu0 %v126_v20  ;;  %v120_v32 = vld [vmem:[#allocation3 + $0x88] sm:$0xff]  ;;  %v151_v33 = vld [vmem:[#allocation3 + $0x180] sm:$0xff]  ;;  %v117_v35 = vld [vmem:[#allocation3 + $0x70] sm:$0xff] }
  0x12   :  { %197 = vmatpush.msra.mxu3 %v157_v21  ;;  %237 = vmatpush.msrb.mxu1 %v158_v22  ;;  %v152_v34 = vld [vmem:[#allocation3 + $0x188] sm:$0xff]  ;;  %v118_v36 = vld [vmem:[#allocation3 + $0x78] sm:$0xff]  ;;  %v149_v37 = vld [vmem:[#allocation3 + $0x170] sm:$0xff] }
  0x13   :  { %178 = vmatpush.msra.mxu2 %v123_v23  ;;  %218 = vmatpush.msrb.mxu0 %v124_v24  ;;  %v150_v38 = vld [vmem:[#allocation3 + $0x178] sm:$0xff]  ;;  %v115_v39 = vld [vmem:[#allocation3 + $0x60] sm:$0xff]  ;;  %v116_v40 = vld [vmem:[#allocation3 + $0x68] sm:$0xff] }
  0x14   :  { %198 = vmatpush.msra.mxu3 %v155_v25  ;;  %238 = vmatpush.msrb.mxu1 %v156_v26  ;;  %v147_v41 = vld [vmem:[#allocation3 + $0x160] sm:$0xff]  ;;  %v148_v42 = vld [vmem:[#allocation3 + $0x168] sm:$0xff]  ;;  %v113_v43 = vld [vmem:[#allocation3 + $0x50] sm:$0xff] }
  0x15   :  { %179 = vmatpush.msra.mxu2 %v121_v27  ;;  %219 = vmatpush.msrb.mxu0 %v122_v28  ;;  %v114_v44 = vld [vmem:[#allocation3 + $0x58] sm:$0xff]  ;;  %v145_v45 = vld [vmem:[#allocation3 + $0x150] sm:$0xff]  ;;  %v111_v47 = vld [vmem:[#allocation3 + $0x40] sm:$0xff] }
  0x16   :  { %199 = vmatpush.msra.mxu3 %v153_v29  ;;  %239 = vmatpush.msrb.mxu1 %v154_v30  ;;  %v146_v46 = vld [vmem:[#allocation3 + $0x158] sm:$0xff]  ;;  %v112_v48 = vld [vmem:[#allocation3 + $0x48] sm:$0xff]  ;;  %v143_v49 = vld [vmem:[#allocation3 + $0x140] sm:$0xff] }
  0x17   :  { %180 = vmatpush.msra.mxu2 %v119_v31  ;;  %220 = vmatpush.msrb.mxu0 %v120_v32  ;;  %v144_v50 = vld [vmem:[#allocation3 + $0x148] sm:$0xff]  ;;  %v109_v51 = vld [vmem:[#allocation3 + $0x30] sm:$0xff]  ;;  %v110_v52 = vld [vmem:[#allocation3 + $0x38] sm:$0xff] }
  0x18   :  { %200 = vmatpush.msra.mxu3 %v151_v33  ;;  %240 = vmatpush.msrb.mxu1 %v152_v34  ;;  %v107_v53 = vld [vmem:[#allocation3 + $0x20] sm:$0xff]  ;;  %v141_v54 = vld [vmem:[#allocation3 + $0x130] sm:$0xff]  ;;  %v108_v55 = vld [vmem:[#allocation3 + $0x28] sm:$0xff] }
  0x19   :  { %181 = vmatpush.msra.mxu2 %v117_v35  ;;  %221 = vmatpush.msrb.mxu0 %v118_v36  ;;  %v142_v56 = vld [vmem:[#allocation3 + $0x138] sm:$0xff]  ;;  %v105_v57 = vld [vmem:[#allocation3 + $0x10] sm:$0xff]  ;;  %v139_v58 = vld [vmem:[#allocation3 + $0x120] sm:$0xff] }
  0x1a   :  { %201 = vmatpush.msra.mxu3 %v149_v37  ;;  %241 = vmatpush.msrb.mxu1 %v150_v38  ;;  %v106_v59 = vld [vmem:[#allocation3 + $0x18] sm:$0xff]  ;;  %v140_v60 = vld [vmem:[#allocation3 + $0x128] sm:$0xff]  ;;  %v103_v61 = vld [vmem:[#allocation3] sm:$0xff] }
  0x1b   :  { %182 = vmatpush.msra.mxu2 %v115_v39  ;;  %222 = vmatpush.msrb.mxu0 %v116_v40  ;;  %v137_v62 = vld [vmem:[#allocation3 + $0x110] sm:$0xff]  ;;  %v104_v63 = vld [vmem:[#allocation3 + $0x8] sm:$0xff]  ;;  %v138_v0 = vld [vmem:[#allocation3 + $0x118] sm:$0xff] }
  0x1c   :  { %202 = vmatpush.msra.mxu3 %v147_v41  ;;  %242 = vmatpush.msrb.mxu1 %v148_v42  ;;  %v135_v1 = vld [vmem:[#allocation3 + $0x100] sm:$0xff]  ;;  %v136_v2 = vld [vmem:[#allocation3 + $0x108] sm:$0xff]  ;;  %v286_v3 = vld [vmem:[%s592_s6 + $0xf8] sm:$0xff] }
  0x1d   :  { %183 = vmatpush.msra.mxu2 %v113_v43  ;;  %223 = vmatpush.msrb.mxu0 %v114_v44  ;;  %v285_v4 = vld [vmem:[%s592_s6 + $0xf0] sm:$0xff]  ;;  %v270_v5 = vld [vmem:[%s592_s6 + $0x78] sm:$0xff]  ;;  %v284_v7 = vld [vmem:[%s592_s6 + $0xe8] sm:$0xff] }
  0x1e   :  { %203 = vmatpush.msra.mxu3 %v145_v45  ;;  %243 = vmatpush.msrb.mxu1 %v146_v46  ;;  %v269_v6 = vld [vmem:[%s592_s6 + $0x70] sm:$0xff]  ;;  %v268_v8 = vld [vmem:[%s592_s6 + $0x68] sm:$0xff]  ;;  %v283_v9 = vld [vmem:[%s592_s6 + $0xe0] sm:$0xff] }
  0x1f   :  { %184 = vmatpush.msra.mxu2 %v111_v47  ;;  %224 = vmatpush.msrb.mxu0 %v112_v48  ;;  %v267_v10 = vld [vmem:[%s592_s6 + $0x60] sm:$0xff]  ;;  %v282_v11 = vld [vmem:[%s592_s6 + $0xd8] sm:$0xff]  ;;  %v281_v13 = vld [vmem:[%s592_s6 + $0xd0] sm:$0xff] }
  0x20   :  { %204 = vmatpush.msra.mxu3 %v143_v49  ;;  %244 = vmatpush.msrb.mxu1 %v144_v50  ;;  %v266_v12 = vld [vmem:[%s592_s6 + $0x58] sm:$0xff]  ;;  %v265_v14 = vld [vmem:[%s592_s6 + $0x50] sm:$0xff]  ;;  %v280_v15 = vld [vmem:[%s592_s6 + $0xc8] sm:$0xff] }
  0x21   :  { %185 = vmatpush.msra.mxu2 %v109_v51  ;;  %225 = vmatpush.msrb.mxu0 %v110_v52  ;;  %v264_v16 = vld [vmem:[%s592_s6 + $0x48] sm:$0xff]  ;;  %v279_v17 = vld [vmem:[%s592_s6 + $0xc0] sm:$0xff]  ;;  %v278_v19 = vld [vmem:[%s592_s6 + $0xb8] sm:$0xff] }
  0x22   :  { %205 = vmatpush.msra.mxu3 %v141_v54  ;;  %245 = vmatpush.msrb.mxu1 %v142_v56  ;;  %v263_v18 = vld [vmem:[%s592_s6 + $0x40] sm:$0xff]  ;;  %v262_v20 = vld [vmem:[%s592_s6 + $0x38] sm:$0xff]  ;;  %v277_v21 = vld [vmem:[%s592_s6 + $0xb0] sm:$0xff] }
  0x23   :  { %186 = vmatpush.msra.mxu2 %v107_v53  ;;  %226 = vmatpush.msrb.mxu0 %v108_v55  ;;  %v276_v22 = vld [vmem:[%s592_s6 + $0xa8] sm:$0xff]  ;;  %v51_v23 = vld [vmem:[%s589_s3] sm:$0x3]  ;;  %v261_v33 = vld [vmem:[%s592_s6 + $0x30] sm:$0xff]  ;;  %s341_s3 = sshll.u32 %s417_s12, 4  ;;  %s342_s3 = int_to_ptr.vmem [resolvable:$true] %s341_s3 }
  0x24   :  { %206 = vmatpush.msra.mxu3 %v139_v58  ;;  %246 = vmatpush.msrb.mxu1 %v140_v60  ;;  %v275_v24 = vld [vmem:[%s592_s6 + $0xa0] sm:$0xff]  ;;  %v53_v25 = vperm.slane %v51_v23, 0  ;;  %v54_v26 = vperm.slane %v51_v23, 1  ;;  %v274_v34 = vld [vmem:[%s592_s6 + $0x98] sm:$0xff]  ;;  %v260_v35 = vld [vmem:[%s592_s6 + $0x28] sm:$0xff] }
  0x25   :  { %187 = vmatpush.msra.mxu2 %v105_v57  ;;  %227 = vmatpush.msrb.mxu0 %v106_v59  ;;  %v273_v36 = vld [vmem:[%s592_s6 + $0x90] sm:$0xff]  ;;  %v259_v37 = vld [vmem:[%s592_s6 + $0x20] sm:$0xff]  ;;  %v272_v38 = vld [vmem:[%s592_s6 + $0x88] sm:$0xff] }
  0x26   :  { %207 = vmatpush.msra.mxu3 %v137_v62  ;;  %247 = vmatpush.msrb.mxu1 %v138_v0  ;;  %v258_v39 = vld [vmem:[%s592_s6 + $0x18] sm:$0xff]  ;;  %v271_v40 = vld [vmem:[%s592_s6 + $0x80] sm:$0xff]  ;;  %v257_v41 = vld [vmem:[%s592_s6 + $0x10] sm:$0xff]  ;;  %v332_v62 = vstv %s586_s0 }
  0x27   :  { %188 = vmatpush.msra.mxu2 %v103_v61  ;;  %228 = vmatpush.msrb.mxu0 %v104_v63  ;;  %v256_v42 = vld [vmem:[%s592_s6 + $0x8] sm:$0xff]  ;;  %v255_v43 = vld [vmem:[%s592_s6] sm:$0xff] }
  0x28   :  { %208 = vmatpush.msra.mxu3 %v135_v1  ;;  %248 = vmatpush.msrb.mxu1 %v136_v2  ;;  %v167_v44 = vld [vmem:[%s591_s5] sm:$0x3] }
  0x29   :  { %291 = vmatpush.msrb.mxu2 %v270_v5  ;;  %v170_v45 = vperm.slane %v167_v44, 1  ;;  %v169_v50 = vperm.slane %v167_v44, 0  ;;  %v359_v57 = vld [vmem:[%s593_s7] ss:$0 sm:$0xff] }
  0x2a   :  { %311 = vmatpush.msrb.mxu3 %v286_v3 }
  0x2b   :  { %292 = vmatpush.msrb.mxu2 %v269_v6 }
  0x2c   :  { %312 = vmatpush.msrb.mxu3 %v285_v4 }
  0x2d   :  { %293 = vmatpush.msrb.mxu2 %v268_v8 }
  0x2e   :  { %313 = vmatpush.msrb.mxu3 %v284_v7 }
  0x2f   :  { %294 = vmatpush.msrb.mxu2 %v267_v10 }
  0x30   :  { %314 = vmatpush.msrb.mxu3 %v283_v9 }
  0x31   :  { %295 = vmatpush.msrb.mxu2 %v266_v12 }
  0x32   :  { %315 = vmatpush.msrb.mxu3 %v282_v11 }
  0x33   :  { %296 = vmatpush.msrb.mxu2 %v265_v14 }
  0x34   :  { %316 = vmatpush.msrb.mxu3 %v281_v13 }
  0x35   :  { %297 = vmatpush.msrb.mxu2 %v264_v16 }
  0x36   :  { %317 = vmatpush.msrb.mxu3 %v280_v15 }
  0x37   :  { %298 = vmatpush.msrb.mxu2 %v263_v18 }
  0x38   :  { %318 = vmatpush.msrb.mxu3 %v279_v17 }
  0x39   :  { %299 = vmatpush.msrb.mxu2 %v262_v20 }
  0x3a   :  { %319 = vmatpush.msrb.mxu3 %v278_v19 }
  0x3b   :  { %300 = vmatpush.msrb.mxu2 %v261_v33 }
  0x3c   :  { %320 = vmatpush.msrb.mxu3 %v277_v21 }
  0x3d   :  { %301 = vmatpush.msrb.mxu2 %v260_v35 }
  0x3e   :  { %321 = vmatpush.msrb.mxu3 %v276_v22 }
  0x3f   :  { %302 = vmatpush.msrb.mxu2 %v259_v37 }
  0x40   :  { %322 = vmatpush.msrb.mxu3 %v275_v24 }
  0x41   :  { %303 = vmatpush.msrb.mxu2 %v258_v39 }
  0x42   :  { %323 = vmatpush.msrb.mxu3 %v274_v34 }
  0x43   :  { %304 = vmatpush.msrb.mxu2 %v257_v41 }
  0x44   :  { %324 = vmatpush.msrb.mxu3 %v273_v36 }
  0x45   :  { %305 = vmatpush.msrb.mxu2 %v256_v42 }
  0x46   :  { %325 = vmatpush.msrb.mxu3 %v272_v38 }
  0x47   :  { %306 = vmatpush.msrb.mxu2 %v255_v43 }
  0x48   :  { %326 = vmatpush.msrb.mxu3 %v271_v40 }
  0x85   :  { %v78_v27 = vpop.f32.mrf.mxu0  ;;  %v98_v28 = vpop.f32.mrf.mxu1 }
  0x86   :  { %v79_v29 = vadd.f32 %v78_v27, %v53_v25  ;;  %v99_v30 = vadd.f32 %v98_v28, %v54_v26 }
  0x88   :  { %v101_v31 = vmax.f32 %v79_v29, 0.0  ;;  %v102_v32 = vmax.f32 %v99_v30, 0.0 }
  0x8a   :  { %189 = vmatmul.f32.vlgmr.msra.gmra.mxu2 %v101_v31  ;;  %229 = vmatmul.f32.vlgmr.msrb.gmra.mxu0 %v101_v31 }
  0x8b   :  { %209 = vmatmul.f32.vlgmr.msra.gmra.mxu3 %v102_v32  ;;  %249 = vmatmul.f32.vlgmr.msrb.gmra.mxu1 %v102_v32 }
 0x107   :  { %v230_v46 = vpop.f32.mrf.mxu0 }
 0x108   :  { %v231_v47 = vadd.f32 %v230_v46, %v170_v45  ;;  %v250_v48 = vpop.f32.mrf.mxu1 }
 0x10a   :  { %v251_v49 = vadd.f32 %v250_v48, %v231_v47 }
 0x10c   :  { %v254_v51 = vmax.f32 %v251_v49, 0.0 }
 0x10d   :  { %v190_v52 = vpop.f32.mrf.mxu2 }
 0x10e   :  { %v191_v53 = vadd.f32 %v190_v52, %v169_v50  ;;  %327 = vmatmul.f32.vlgmr.msrb.gmra.mxu3 %v254_v51  ;;  %v210_v54 = vpop.f32.mrf.mxu3 }
 0x110   :  { %v211_v55 = vadd.f32 %v210_v54, %v191_v53 }
 0x112   :  { %v253_v56 = vmax.f32 %v211_v55, 0.0 }
 0x114   :  { %307 = vmatmul.f32.vlgmr.msrb.gmra.mxu2 %v253_v56 }
 0x191   :  { %v328_v60 = vpop.f32.mrf.mxu3 }
 0x197   :  { %v308_v58 = vpop.f32.mrf.mxu2 }
 0x198   :  { %v309_v59 = vadd.f32 %v359_v57, %v308_v58 }
 0x19a   :  { %v329_v61 = vadd.f32 %v328_v60, %v309_v59 }
 0x19c   :  { %360 = vtanh.f32 %v329_v61 }
 0x1a2   :  { %v361_v63 = vpop.eup %360 }
 0x1a3   :  { %v333_v0 = vmul.f32 %v361_v63, %v332_v62 }
 0x1a5   :  { %335 = vst.msk [vmem:[#allocation6] sm:$0x3] %vm334_vm1, %v333_v0 }
 0x1a6   :  { %346 = dma.vmem_to_hbm [thread:$0]  %s342_s3, 32, %s344_s15, [#allocation5]  }
 0x1a7   :  { %412 = dma.done.wait [#allocation5], 32  }
 0x1a8   :  { %413 = vsyncadd [#allocation5], 4294967264 }
 0x1a9   :  { %351 = vsyncpa [#allocation4], 1 }
 0x1aa   :  { %352 = vsyncpa [#allocation5], 1 }

</bundles_post_ra>
